<compile_context>
chip_gen: v7x
topology: tpu7x:2x2x1
jax: 0.10.0
libtpu: 0.0.40
codegen_flags: <defaults>
</compile_context>

<pallas_src>
import math
import jax
import jax.numpy as jnp
from jax import lax
from jax.experimental import pallas as pl
from jax.experimental.pallas import tpu as pltpu


def _round_up(x, m):
    return (x + m - 1) // m * m


def _vmem_capacity_bytes():
    # Generation-aware VMEM capacity (v5e/v6e: 128 MiB, v7x: 64 MiB per TC).
    try:
        info = pltpu.get_tpu_info()
        cap = getattr(info, "vmem_capacity_bytes", None)
        if cap:
            return int(cap)
    except Exception:
        pass
    return 64 << 20  # conservative (v7x per-TensorCore)


# Contract x dim 1 with weight dim 1: result[i, j] = sum_k x[i, k] * w[j, k]  (== x @ w.T)
_DIMS = (((1,), (1,)), ((), ()))


def _tile_matmul(x_ref, w_ref):
    return lax.dot_general(x_ref[...], w_ref[...], dimension_numbers=_DIMS,
                           preferred_element_type=jnp.float32)


# ---- f32-output kernels: accumulate directly into the resident output block ----
def _kernel_f32_bias(x_ref, w_ref, b_ref, o_ref):
    k = pl.program_id(2)

    @pl.when(k == 0)
    def _init():
        o_ref[...] = jnp.zeros_like(o_ref)

    o_ref[...] += _tile_matmul(x_ref, w_ref)

    @pl.when(k == pl.num_programs(2) - 1)
    def _finalize():
        o_ref[...] += b_ref[...].astype(jnp.float32)


def _kernel_f32_nobias(x_ref, w_ref, o_ref):
    k = pl.program_id(2)

    @pl.when(k == 0)
    def _init():
        o_ref[...] = jnp.zeros_like(o_ref)

    o_ref[...] += _tile_matmul(x_ref, w_ref)


# ---- low-precision-output kernels: f32 VMEM accumulator scratch ----
def _kernel_acc_bias(x_ref, w_ref, b_ref, o_ref, acc_ref):
    k = pl.program_id(2)

    @pl.when(k == 0)
    def _init():
        acc_ref[...] = jnp.zeros_like(acc_ref)

    acc_ref[...] += _tile_matmul(x_ref, w_ref)

    @pl.when(k == pl.num_programs(2) - 1)
    def _finalize():
        o_ref[...] = (acc_ref[...] + b_ref[...].astype(jnp.float32)).astype(o_ref.dtype)


def _kernel_acc_nobias(x_ref, w_ref, o_ref, acc_ref):
    k = pl.program_id(2)

    @pl.when(k == 0)
    def _init():
        acc_ref[...] = jnp.zeros_like(acc_ref)

    acc_ref[...] += _tile_matmul(x_ref, w_ref)

    @pl.when(k == pl.num_programs(2) - 1)
    def _finalize():
        o_ref[...] = acc_ref[...].astype(o_ref.dtype)


def pallas_linear(x, weight, bias=None, *, tm=512, tn=512, tk=1024):
    """Equivalent of _Linear.forward: x @ weight.T (+ bias)."""
    N, K = x.shape
    M, K2 = weight.shape
    assert K == K2, "in_features mismatch"

    x_itemsize = jnp.dtype(x.dtype).itemsize
    w_itemsize = jnp.dtype(weight.dtype).itemsize
    out_dtype = x.dtype
    o_itemsize = jnp.dtype(out_dtype).itemsize
    b_itemsize = jnp.dtype(bias.dtype).itemsize if bias is not None else 0

    # dtype-native sublane multiple for the M (row) tile; lane dims multiple of 128
    sublane = {1: 32, 2: 16, 4: 8}.get(x_itemsize, 8)
    tm = min(tm, _round_up(N, sublane))
    tn = min(tn, _round_up(M, 128))
    tk = min(tk, _round_up(K, 128))

    grid_m = pl.cdiv(N, tm)
    grid_n = pl.cdiv(M, tn)
    # v7x shards the "parallel" grid axes across 2 TensorCores; keep >= 2 output
    # blocks when the problem allows it so neither core idles.
    if grid_m * grid_n == 1 and M > 128:
        tn = _round_up(pl.cdiv(M, 2), 128)
        grid_n = pl.cdiv(M, tn)

    # Only the contraction axis needs exact zeros for correctness; M/N edges are
    # handled by Pallas edge-block masking (stale rows/cols only touch output
    # positions that are never written back).
    Kp = _round_up(K, tk)
    grid_k = Kp // tk
    grid = (grid_m, grid_n, grid_k)

    x_p = jnp.pad(x, ((0, 0), (0, Kp - K))) if Kp != K else x
    w_p = jnp.pad(weight, ((0, 0), (0, Kp - K))) if Kp != K else weight

    in_specs = [
        pl.BlockSpec((tm, tk), lambda i, j, k: (i, k)),   # x tile
        pl.BlockSpec((tn, tk), lambda i, j, k: (j, k)),   # weight tile (native layout)
    ]
    operands = [x_p, w_p]
    if bias is not None:
        in_specs.append(pl.BlockSpec((1, tn), lambda i, j, k: (0, j)))
        operands.append(bias.reshape(1, M))               # native dtype, f32 add in-kernel

    acc_in_out = (jnp.dtype(out_dtype) == jnp.float32)
    if acc_in_out:
        kernel = _kernel_f32_bias if bias is not None else _kernel_f32_nobias
        scratch_shapes = []
    else:
        kernel = _kernel_acc_bias if bias is not None else _kernel_acc_nobias
        scratch_shapes = [pltpu.VMEM((tm, tn), jnp.float32)]

    # VMEM budget: double-buffered input tiles + double-buffered output tile
    # (+ optional f32 accumulator), clamped to this generation's capacity.
    need = (2 * (tm * tk * x_itemsize + tn * tk * w_itemsize + tn * b_itemsize)
            + 2 * tm * tn * o_itemsize
            + (0 if acc_in_out else tm * tn * 4)
            + (4 << 20))                                   # headroom
    cap = _vmem_capacity_bytes()
    vmem_limit = int(min(max(need, 32 << 20), int(cap * 0.9)))
    vmem_limit = max(vmem_limit, int(need))

    # Advisory cost estimate including tile re-fetch traffic.
    cost = pl.CostEstimate(
        flops=2 * N * M * Kp,
        transcendentals=0,
        bytes_accessed=int(N * Kp * grid_n * x_itemsize
                           + M * Kp * grid_m * w_itemsize
                           + N * M * o_itemsize
                           + M * b_itemsize * grid_m),
    )

    out = pl.pallas_call(
        kernel,
        out_shape=jax.ShapeDtypeStruct((N, M), out_dtype),
        grid_spec=pltpu.PrefetchScalarGridSpec(
            num_scalar_prefetch=0,
            grid=grid,
            in_specs=in_specs,
            out_specs=pl.BlockSpec((tm, tn), lambda i, j, k: (i, j)),
            scratch_shapes=scratch_shapes,
        ),
        compiler_params=pltpu.CompilerParams(
            dimension_semantics=("parallel", "parallel", "arbitrary"),
            vmem_limit_bytes=vmem_limit,
        ),
        cost_estimate=cost,
    )(*operands)

    return out


def init_linear_params(key, in_features, out_features, use_bias=True):
    """Mirror Linear.reset_parameters: uniform(-stdv, stdv), stdv = 1/sqrt(in_features)."""
    stdv = 1.0 / math.sqrt(in_features)
    k_w, k_b = jax.random.split(key)
    weight = jax.random.uniform(
        k_w, (out_features, in_features), dtype=jnp.float32,
        minval=-stdv, maxval=stdv)
    bias = None
    if use_bias:
        bias = jax.random.uniform(
            k_b, (out_features,), dtype=jnp.float32,
            minval=-stdv, maxval=stdv)
    return weight, bias


# TODO(synk): backward pass (grad_input / grad_weight / grad_bias) of _Linear is not
# implemented; only the forward semantics are covered.

if __name__ == "__main__":
    key = jax.random.PRNGKey(0)
    k_x, k_p = jax.random.split(key)

    batch = 8
    in_features = 32
    out_features = 16

    x = jax.random.normal(k_x, (batch, in_features), dtype=jnp.float32)
    weight, bias = init_linear_params(k_p, in_features, out_features, use_bias=True)

    # with bias
    out = jax.block_until_ready(pallas_linear(x, weight, bias))
    ref = x @ weight.T + bias[None, :]
    assert out.shape == (batch, out_features)
    assert jnp.allclose(out, ref, atol=1e-5, rtol=1e-5)

    # without bias (bias=None path of _Linear)
    out_nb = jax.block_until_ready(pallas_linear(x, weight, None))
    assert jnp.allclose(out_nb, x @ weight.T, atol=1e-5, rtol=1e-5)

    print("KERNEL_OK")
</pallas_src>

<mosaic_0001>
module attributes {stable_mosaic.version = 11 : i64} {
  func.func @_kernel_f32_bias(%arg0: i32, %arg1: i32, %arg2: i32, %arg3: memref<8x128xf32, #tpu.memory_space<vmem>>, %arg4: memref<128x128xf32, #tpu.memory_space<vmem>>, %arg5: memref<1x128xf32, #tpu.memory_space<vmem>>, %arg6: memref<8x128xf32, #tpu.memory_space<vmem>>) attributes {dimension_semantics = [#tpu.dimension_semantics<parallel>, #tpu.dimension_semantics<parallel>, #tpu.dimension_semantics<arbitrary>], iteration_bounds = array<i64: 1, 1, 1>, scalar_prefetch = 0 : i64, scratch_operands = 0 : i64, tpu.core_type = #tpu.core_type<tc>, window_params = [{transform_indices = @transform_0, window_bounds = array<i64: 8, 128>}, {transform_indices = @transform_1, window_bounds = array<i64: 128, 128>}, {transform_indices = @transform_2, window_bounds = array<i64: 1, 128>}, {transform_indices = @transform_3, window_bounds = array<i64: 8, 128>}]} {
    %c0_i32 = arith.constant 0 : i32
    %0 = arith.cmpi eq, %arg2, %c0_i32 : i32
    %1 = arith.extui %0 : i1 to i32
    %c0_i32_0 = arith.constant 0 : i32
    %2 = arith.cmpi ne, %1, %c0_i32_0 : i32
    scf.if %2 {
      %cst_10 = arith.constant 0.000000e+00 : f32
      %12 = vector.broadcast %cst_10 : f32 to vector<8x128xf32>
      %c0_11 = arith.constant 0 : index
      %c0_12 = arith.constant 0 : index
      %13 = vector.load %arg6[%c0_11, %c0_12] : memref<8x128xf32, #tpu.memory_space<vmem>>, vector<8x128xf32>
      tpu.vector_store %arg6[%c0_11, %c0_12], %12 {strides = array<i32>} : memref<8x128xf32, #tpu.memory_space<vmem>>, vector<8x128xf32>,
    } else {
    }
    %c0 = arith.constant 0 : index
    %c0_1 = arith.constant 0 : index
    %3 = vector.load %arg6[%c0, %c0_1] : memref<8x128xf32, #tpu.memory_space<vmem>>, vector<8x128xf32>
    %c0_2 = arith.constant 0 : index
    %c0_3 = arith.constant 0 : index
    %4 = vector.load %arg3[%c0_2, %c0_3] : memref<8x128xf32, #tpu.memory_space<vmem>>, vector<8x128xf32>
    %c0_4 = arith.constant 0 : index
    %c0_5 = arith.constant 0 : index
    %5 = vector.load %arg4[%c0_4, %c0_5] : memref<128x128xf32, #tpu.memory_space<vmem>>, vector<128x128xf32>
    %cst = arith.constant dense<0.000000e+00> : vector<8x128xf32>
    %6 = tpu.matmul %4, %5, %cst {dimension_numbers = #tpu.dot_dimension_numbers<[1], [1], [0], [0], [0, 0, 1, 0], [], []>} : vector<8x128xf32>, vector<128x128xf32>, vector<8x128xf32> -> vector<8x128xf32>
    %7 = arith.addf %3, %6 : vector<8x128xf32>
    %c0_6 = arith.constant 0 : index
    %c0_7 = arith.constant 0 : index
    %8 = vector.load %arg6[%c0_6, %c0_7] : memref<8x128xf32, #tpu.memory_space<vmem>>, vector<8x128xf32>
    tpu.vector_store %arg6[%c0_6, %c0_7], %7 {strides = array<i32>} : memref<8x128xf32, #tpu.memory_space<vmem>>, vector<8x128xf32>,
    %c0_i32_8 = arith.constant 0 : i32
    %9 = arith.cmpi eq, %arg2, %c0_i32_8 : i32
    %10 = arith.extui %9 : i1 to i32
    %c0_i32_9 = arith.constant 0 : i32
    %11 = arith.cmpi ne, %10, %c0_i32_9 : i32
    scf.if %11 {
      %c0_10 = arith.constant 0 : index
      %c0_11 = arith.constant 0 : index
      %12 = vector.load %arg6[%c0_10, %c0_11] : memref<8x128xf32, #tpu.memory_space<vmem>>, vector<8x128xf32>
      %c0_12 = arith.constant 0 : index
      %c0_13 = arith.constant 0 : index
      %13 = vector.load %arg5[%c0_12, %c0_13] : memref<1x128xf32, #tpu.memory_space<vmem>>, vector<1x128xf32>
      %14 = vector.broadcast %13 : vector<1x128xf32> to vector<8x128xf32>
      %15 = arith.addf %12, %14 : vector<8x128xf32>
      %c0_14 = arith.constant 0 : index
      %c0_15 = arith.constant 0 : index
      %16 = vector.load %arg6[%c0_14, %c0_15] : memref<8x128xf32, #tpu.memory_space<vmem>>, vector<8x128xf32>
      tpu.vector_store %arg6[%c0_14, %c0_15], %15 {strides = array<i32>} : memref<8x128xf32, #tpu.memory_space<vmem>>, vector<8x128xf32>,
    } else {
    }
    return
  }
  func.func @transform_0(%arg0: i32, %arg1: i32, %arg2: i32) -> (i32, i32) {
    %c0_i32 = arith.constant 0 : i32
    return %arg0, %arg2 : i32, i32
  }
  func.func @transform_1(%arg0: i32, %arg1: i32, %arg2: i32) -> (i32, i32) {
    %c0_i32 = arith.constant 0 : i32
    return %arg1, %arg2 : i32, i32
  }
  func.func @transform_2(%arg0: i32, %arg1: i32, %arg2: i32) -> (i32, i32) {
    %c0_i32 = arith.constant 0 : i32
    %c0_i32_0 = arith.constant 0 : i32
    return %c0_i32, %arg1 : i32, i32
  }
  func.func @transform_3(%arg0: i32, %arg1: i32, %arg2: i32) -> (i32, i32) {
    %c0_i32 = arith.constant 0 : i32
    return %arg0, %arg1 : i32, i32
  }
}

</mosaic_0001>

<bundles_post_ra>
// kernel: tpu_custom_call.1
= control target key start
LH: loop header
LB: loop body
LE: loop exit
PB: predicated region body
PF: predicated region fallthrough
CT: control target
= control target key end

     0   :  { %8 = vsyncpa [#allocation3], 0  ;;  %s389_s0 = inlined_call_operand.hbm [shape: f32[8,128], index: 0, kind: input, shape index: {}]   ;;  %s390_s1 = inlined_call_operand.hbm [shape: f32[16,128], index: 1, kind: input, shape index: {}]   ;;  %s391_s2 = inlined_call_operand.vmem [shape: f32[1,16], index: 2, kind: input, shape index: {}]   ;;  %s392_s3 = inlined_call_operand.hbm [shape: f32[8,16], index: 3, kind: output, shape index: {}]  }
   0x1   :  { %9 = vsyncpa [#allocation6], 0 }
   0x2   :  { %10 = vsyncpa [#allocation4], 0  ;;  %s322_s12 = smov [#allocation2]   ;;  %s250_s16 = scalar_lea.hbm %s389_s0, 128 }
   0x3   :  { %s17_s13 = sshll.u32 %s322_s12, 4  ;;  %p251_p0 = scmp.ne.s32.totalorder %s389_s0, %s250_s16  ;;  %s18_s13 = int_to_ptr.vmem [resolvable:$true] %s17_s13 }
   0x4   :  { %p254_p1 = scmp.lt.u32.totalorder %s250_s16, %s389_s0 }
   0x6   :  { %p256_p2 = pnand %p254_p1, %p251_p0 }
   0x8   :  { %259 = shalt.err (!%p256_p2)
}
   0x9   :  { %s260_s21 = scalar_lea.vmem %s18_s13, 128  ;;  %p265_p4 = scmp.lt.s32.totalorder %s18_s13, %s18_s13 }
   0xa   :  { %p261_p3 = scmp.ne.s32.totalorder %s18_s13, %s260_s21  ;;  %p266_p5 = scmp.lt.s32.totalorder %s260_s21, %s260_s21 }
   0xc   :  { %p267_p6 = por %p266_p5, %p265_p4 }
   0xe   :  { %p268_p7 = pnand %p267_p6, %p261_p3 }
  0x10   :  { %271 = shalt.err (!%p268_p7)
}
  0x11   :  { %20 = dma.hbm_to_vmem [thread:$0]  %s389_s0, 128, %s18_s13, [#allocation3]  }
  0x12   :  { %25 = vsyncadd [#allocation6], 1792  ;;  %s323_s24 = smov [#allocation5]   ;;  %s272_s28 = scalar_lea.hbm %s390_s1, 256 }
  0x13   :  { %s26_s25 = sshll.u32 %s323_s24, 4  ;;  %p273_p8 = scmp.ne.s32.totalorder %s390_s1, %s272_s28  ;;  %s27_s25 = int_to_ptr.vmem [resolvable:$true] %s26_s25 }
  0x14   :  { %p276_p9 = scmp.lt.u32.totalorder %s272_s28, %s390_s1 }
  0x16   :  { %p278_p10 = pnand %p276_p9, %p273_p8 }
  0x18   :  { %281 = shalt.err (!%p278_p10)
}
  0x19   :  { %s282_s6 = scalar_lea.vmem %s27_s25, 256  ;;  %s286_s0 = scalar_lea.vmem %s27_s25, 2048 }
  0x1a   :  { %p283_p11 = scmp.ne.s32.totalorder %s27_s25, %s282_s6  ;;  %p287_p12 = scmp.lt.s32.totalorder %s27_s25, %s27_s25 }
  0x1b   :  { %p288_p13 = scmp.lt.s32.totalorder %s286_s0, %s282_s6 }
  0x1d   :  { %p289_p0 = por %p288_p13, %p287_p12 }
  0x1f   :  { %p290_p1 = pnand %p289_p0, %p283_p11 }
  0x21   :  { %293 = shalt.err (!%p290_p1)
}
  0x22   :  { %s324_s7 = smov 128   ;;  %s325_s8 = smov 8  }
  0x23   :  { %32 = dma.hbm_to_vmem [thread:$0]  %s390_s1, 256, %s27_s25, [#allocation6], %s324_s7, %s324_s7, %s325_s8  }
  0x24   :  { %316 = dma.done.wait [#allocation3], 128  }
  0x25   :  { %317 = vsyncadd [#allocation3], 4294967168 }
  0x26   :  { %318 = dma.done.wait [#allocation6], 2048  }
  0x27   :  { %319 = vsyncadd [#allocation6], 4294965248  ;;  %v326_v0 = vmov 0.0|0.0   ;;  %vm327_vm0 = vmmov 0   ;;  %v328_v1 = vmov 0.0   ;;  %v48_v2 = vld [vmem:[#allocation5] sm:$0xff] }
  0x28   :  { %218 = vmatprep.subr.bf16.mxu0 %v326_v0  ;;  %215 = vmatprep.mubr.msk.f32.mxu0 %vm327_vm0, %v328_v1  ;;  %v49_v3 = vld [vmem:[#allocation5 + $0x8] sm:$0xff]  ;;  %v50_v5 = vld [vmem:[#allocation5 + $0x10] sm:$0xff]  ;;  %v51_v6 = vld [vmem:[#allocation5 + $0x18] sm:$0xff]  ;;  %s329_s12 = smov [#allocation7]  }
  0x29   :  { %v219_v4 = vpack.c.bf16 %v49_v3, %v48_v2  ;;  %v222_v7 = vpack.c.bf16 %v51_v6, %v50_v5  ;;  %v52_v8 = vld [vmem:[#allocation5 + $0x20] sm:$0xff]  ;;  %v53_v9 = vld [vmem:[#allocation5 + $0x28] sm:$0xff]  ;;  %v54_v11 = vld [vmem:[#allocation5 + $0x30] sm:$0xff]  ;;  %s155_s13 = sshll.u32 %s329_s12, 4  ;;  %s156_s13 = int_to_ptr.vmem [resolvable:$true] %s155_s13 }
  0x2a   :  { %v225_v10 = vpack.c.bf16 %v53_v9, %v52_v8  ;;  %v55_v12 = vld [vmem:[#allocation5 + $0x38] sm:$0xff]  ;;  %v56_v14 = vld [vmem:[#allocation5 + $0x40] sm:$0xff]  ;;  %v57_v15 = vld [vmem:[#allocation5 + $0x48] sm:$0xff]  ;;  %s294_s14 = scalar_lea.vmem %s156_s13, 128  ;;  %p299_p3 = scmp.lt.s32.totalorder %s156_s13, %s156_s13 }
  0x2b   :  { %220 = vmatpush3.bf16.xpose.msra.mxu0 %v219_v4  ;;  %v228_v13 = vpack.c.bf16 %v55_v12, %v54_v11  ;;  %v231_v16 = vpack.c.bf16 %v57_v15, %v56_v14  ;;  %v58_v17 = vld [vmem:[#allocation5 + $0x50] sm:$0xff]  ;;  %v59_v18 = vld [vmem:[#allocation5 + $0x58] sm:$0xff]  ;;  %v60_v20 = vld [vmem:[#allocation5 + $0x60] sm:$0xff]  ;;  %p295_p2 = scmp.ne.s32.totalorder %s156_s13, %s294_s14  ;;  %p300_p4 = scmp.lt.s32.totalorder %s294_s14, %s294_s14 }
  0x2c   :  { %221 = vmatprep.subr.bf16.mxu0 %v326_v0  ;;  %v234_v19 = vpack.c.bf16 %v59_v18, %v58_v17  ;;  %v61_v21 = vld [vmem:[#allocation5 + $0x68] sm:$0xff]  ;;  %v62_v23 = vld [vmem:[#allocation5 + $0x70] sm:$0xff]  ;;  %v63_v24 = vld [vmem:[#allocation5 + $0x78] sm:$0xff] }
  0x2d   :  { %v237_v22 = vpack.c.bf16 %v61_v21, %v60_v20  ;;  %v240_v25 = vpack.c.bf16 %v63_v24, %v62_v23  ;;  %v47_v26 = vld [vmem:[#allocation2] sm:$0xff]  ;;  %p301_p5 = por %p300_p4, %p299_p3 }
  0x2e   :  { %v165_v28 = vld [vmem:[%s391_s2] ss:$0 sm:$0xff] }
  0x2f   :  { %p302_p6 = pnand %p301_p5, %p295_p2 }
  0x33   :  { %223 = vmatpush3.bf16.xpose.msra.mxu0 %v222_v7 }
  0x34   :  { %224 = vmatprep.subr.bf16.mxu0 %v326_v0 }
  0x3b   :  { %226 = vmatpush3.bf16.xpose.msra.mxu0 %v225_v10 }
  0x3c   :  { %227 = vmatprep.subr.bf16.mxu0 %v326_v0 }
  0x43   :  { %229 = vmatpush3.bf16.xpose.msra.mxu0 %v228_v13 }
  0x44   :  { %230 = vmatprep.subr.bf16.mxu0 %v326_v0 }
  0x4b   :  { %232 = vmatpush3.bf16.xpose.msra.mxu0 %v231_v16 }
  0x4c   :  { %233 = vmatprep.subr.bf16.mxu0 %v326_v0 }
  0x53   :  { %235 = vmatpush3.bf16.xpose.msra.mxu0 %v234_v19 }
  0x54   :  { %236 = vmatprep.subr.bf16.mxu0 %v326_v0 }
  0x5b   :  { %238 = vmatpush3.bf16.xpose.msra.mxu0 %v237_v22 }
  0x5c   :  { %239 = vmatprep.subr.bf16.mxu0 %v326_v0 }
  0x63   :  { %241 = vmatpush3.bf16.xpose.msra.mxu0 %v240_v25 }
  0x6a   :  { %216 = vmatmul.mubr.f32.vlgmr.msra.gmra.mrb[0].mxu0 %v47_v26 }
 0x13d   :  { %v130_v27 = vpop.f32.mrb[0].mxu0 }
 0x13e   :  { %v217_v29 = vpop.f32.mrb[1].mxu0  ;;  %v147_v30 = vadd.f32 %v165_v28, %v130_v27 }
 0x140   :  { %148 = vst [vmem:[#allocation7] sm:$0xff] %v147_v30 }
 0x141   :  { %305 = shalt.err (!%p302_p6)
}
 0x142   :  { %s306_s17 = scalar_lea.hbm %s392_s3, 128 }
 0x143   :  { %p307_p7 = scmp.ne.s32.totalorder %s392_s3, %s306_s17  ;;  %p310_p8 = scmp.lt.u32.totalorder %s306_s17, %s392_s3 }
 0x145   :  { %p312_p9 = pnand %p310_p8, %p307_p7 }
 0x147   :  { %315 = shalt.err (!%p312_p9)
}
 0x148   :  { %158 = dma.vmem_to_hbm [thread:$0]  %s156_s13, 128, %s392_s3, [#allocation4]  }
 0x149   :  { %320 = dma.done.wait [#allocation4], 128  }
 0x14a   :  { %321 = vsyncadd [#allocation4], 4294967168 }
 0x14b   :  { %162 = vsyncpa [#allocation3], 1 }
 0x14c   :  { %163 = vsyncpa [#allocation6], 1 }
 0x14d   :  { %164 = vsyncpa [#allocation4], 1 }

</bundles_post_ra>
